<compile_context>
chip_gen: v5e
topology: v5e:2x2
jax: 0.10.0
libtpu: 0.0.40
codegen_flags: <defaults>
</compile_context>

<pallas_src>
import functools

import jax
import jax.numpy as jnp
from jax import lax
from jax.experimental import pallas as pl
from jax.experimental.pallas import tpu as pltpu


def _channel_to_space_kernel(x_ref, s_ref, o_ref, xcat_ref, *,
                             bs, c_tile, W, precision, compute_dtype):
    # x_ref : (bs*bs, c_tile, h_tile, W)        input channel tiles
    # s_ref : (bs*W, bs*W)                      0/1 lane-interleave matrix
    # o_ref : (1, c_tile, h_tile, bs*bs*W)      lane-dense presented output
    # xcat_ref: (h_tile, bs*W) VMEM scratch     fused matmul operand
    wb = W * bs
    s_mat = s_ref[...]
    for c in range(c_tile):                 # static unroll
        for i in range(bs):                 # static unroll (row phase)
            for j in range(bs):             # static unroll (column phase)
                xcat_ref[:, j * W:(j + 1) * W] = (
                    x_ref[i * bs + j, c, :, :].astype(compute_dtype))
            # Y[h, w*bs + j] = x_{i,j}[h, w]  -- exact permutation matmul.
            y = jnp.dot(xcat_ref[...], s_mat,
                        preferred_element_type=jnp.float32,
                        precision=precision)
            # Contiguous lane slab at a static offset: no strided / masked
            # row scatter, no accumulator.
            o_ref[0, c, :, i * wb:(i + 1) * wb] = y.astype(o_ref.dtype)


def _pick_tiles(c_out, H, W, bs, itemsize,
                budget_bytes=8 * 1024 * 1024, max_c_tile=8):
    """Pick (c_tile, h_tile): biggest blocks that stay well inside the default
    scoped-VMEM limit of v5e/v6e/v7x once double-buffered (in + out)."""
    # double-buffered input block + double-buffered output block, per output
    # channel per output-row group (each holds bs*bs*W elements per row).
    unit = 4 * bs * bs * W * itemsize
    if H * unit <= budget_bytes:
        h_tile = H
        c_tile = 1
        for d in range(2, min(c_out, max_c_tile) + 1):
            if c_out % d == 0 and d * H * unit <= budget_bytes:
                c_tile = d
        return c_tile, h_tile
    # A single channel at full H already blows the budget: tile H instead.
    # h_tile must be a multiple of 8 that divides H (8,128 tiling rule); fall
    # back to the full extent for correctness if none exists.
    h_tile = H
    for t in range(8, H, 8):
        if H % t == 0 and t * unit <= budget_bytes:
            h_tile = t
    # TODO(synk): add W tiling / vmem_limit_bytes for extremely wide images
    # where even 8 rows of the bs*bs*W-wide blocks exceed the scoped budget.
    return 1, h_tile


def channel_to_space(x, upscale_factor=2):
    bs = int(upscale_factor)
    N, C, H, W = x.shape
    assert C % (bs * bs) == 0, "C must be divisible by upscale_factor**2"
    c_out = C // (bs * bs)

    # Permutation-as-matmul exactness: bf16 data x {0,1} matrix is exact at the
    # default MXU precision; anything else is routed through f32 + HIGHEST so
    # the result stays bit-exact w.r.t. the input values.
    if x.dtype == jnp.bfloat16:
        compute_dtype, precision = jnp.bfloat16, None
    else:
        compute_dtype, precision = jnp.float32, lax.Precision.HIGHEST

    itemsize = jnp.dtype(x.dtype).itemsize
    c_tile, h_tile = _pick_tiles(c_out, H, W, bs, itemsize)

    # Free views (metadata only, no HBM data movement):
    #   input : (N, C, H, W) -> (N*bs*bs, c_out, H, W)
    #   output: kernel writes (N, c_out, H, bs*bs*W); reshaped to
    #           (N, c_out, H*bs, W*bs) afterwards.
    x4 = x.reshape(N * bs * bs, c_out, H, W)

    # Host-precomputed lane-interleave matrix, resident in VMEM across the
    # whole grid:  S[j*W + w, w*bs + j] = 1.
    k = jnp.arange(bs * W)
    s_mat = (((k % W) * bs + (k // W))[:, None]
             == jnp.arange(bs * W)[None, :]).astype(compute_dtype)

    wb2 = bs * bs * W
    grid = (N, c_out // c_tile, H // h_tile)

    kernel = functools.partial(
        _channel_to_space_kernel, bs=bs, c_tile=c_tile, W=W,
        precision=precision, compute_dtype=compute_dtype)

    out3 = pl.pallas_call(
        kernel,
        out_shape=jax.ShapeDtypeStruct((N, c_out, H, wb2), x.dtype),
        grid_spec=pltpu.PrefetchScalarGridSpec(
            num_scalar_prefetch=0,
            grid=grid,
            in_specs=[
                pl.BlockSpec((bs * bs, c_tile, h_tile, W),
                             lambda n, cb, hb: (n, cb, hb, 0)),
                pl.BlockSpec((bs * W, bs * W),
                             lambda n, cb, hb: (0, 0)),
            ],
            out_specs=pl.BlockSpec((1, c_tile, h_tile, wb2),
                                   lambda n, cb, hb: (n, cb, hb, 0)),
            scratch_shapes=[pltpu.VMEM((h_tile, bs * W), compute_dtype)],
        ),
        compiler_params=pltpu.CompilerParams(
            dimension_semantics=("parallel", "parallel", "parallel")),
    )(x4, s_mat)

    return out3.reshape(N, c_out, H * bs, W * bs)


if __name__ == "__main__":
    key = jax.random.PRNGKey(0)
    x = jax.random.normal(key, (2, 4, 16, 16), dtype=jnp.float32)

    out = channel_to_space(x, upscale_factor=2)
    out = jax.block_until_ready(out)

    # Pure-JAX reference mirroring the PyTorch view/permute/view exactly.
    bs = 2
    N, C, H, W = x.shape
    ref = x.reshape(N, bs, bs, C // bs ** 2, H, W)
    ref = jnp.transpose(ref, (0, 3, 4, 1, 5, 2))
    ref = ref.reshape(N, C // bs ** 2, H * bs, W * bs)

    assert out.shape == ref.shape and out.dtype == ref.dtype
    assert jnp.allclose(out, ref, rtol=1e-6, atol=1e-6)
    print("KERNEL_OK")
</pallas_src>

<mosaic_0001>
module attributes {stable_mosaic.version = 11 : i64} {
  func.func @_channel_to_space_kernel(%arg0: i32, %arg1: i32, %arg2: i32, %arg3: memref<4x1x16x16xf32, #tpu.memory_space<vmem>>, %arg4: memref<32x32xf32, #tpu.memory_space<vmem>>, %arg5: memref<1x1x16x64xf32, #tpu.memory_space<vmem>>, %arg6: memref<16x32xf32, #tpu.memory_space<vmem>>) attributes {dimension_semantics = [#tpu.dimension_semantics<parallel>, #tpu.dimension_semantics<parallel>, #tpu.dimension_semantics<parallel>], iteration_bounds = array<i64: 2, 1, 1>, scalar_prefetch = 0 : i64, scratch_operands = 1 : i64, tpu.core_type = #tpu.core_type<tc>, window_params = [{transform_indices = @transform_0, window_bounds = array<i64: 4, 1, 16, 16>}, {pipeline_mode = #tpu.pipeline_mode<synchronous>, transform_indices = @transform_1, window_bounds = array<i64: 32, 32>}, {transform_indices = @transform_2, window_bounds = array<i64: 1, 1, 16, 64>}]} {
    %c0 = arith.constant 0 : index
    %c0_0 = arith.constant 0 : index
    %0 = vector.load %arg4[%c0, %c0_0] : memref<32x32xf32, #tpu.memory_space<vmem>>, vector<32x32xf32>
    %c0_1 = arith.constant 0 : index
    %c0_2 = arith.constant 0 : index
    %c0_3 = arith.constant 0 : index
    %c0_4 = arith.constant 0 : index
    %1 = vector.load %arg3[%c0_1, %c0_2, %c0_3, %c0_4] : memref<4x1x16x16xf32, #tpu.memory_space<vmem>>, vector<1x1x16x16xf32>
    %2 = vector.shape_cast %1 : vector<1x1x16x16xf32> to vector<16x16xf32>
    %c0_5 = arith.constant 0 : index
    %c0_6 = arith.constant 0 : index
    %3 = vector.load %arg6[%c0_5, %c0_6] : memref<16x32xf32, #tpu.memory_space<vmem>>, vector<16x16xf32>
    tpu.vector_store %arg6[%c0_5, %c0_6], %2 {strides = array<i32>} : memref<16x32xf32, #tpu.memory_space<vmem>>, vector<16x16xf32>,
    %c1 = arith.constant 1 : index
    %c0_7 = arith.constant 0 : index
    %c0_8 = arith.constant 0 : index
    %c0_9 = arith.constant 0 : index
    %4 = vector.load %arg3[%c1, %c0_7, %c0_8, %c0_9] : memref<4x1x16x16xf32, #tpu.memory_space<vmem>>, vector<1x1x16x16xf32>
    %5 = vector.shape_cast %4 : vector<1x1x16x16xf32> to vector<16x16xf32>
    %c0_10 = arith.constant 0 : index
    %c16 = arith.constant 16 : index
    %6 = vector.load %arg6[%c0_10, %c16] : memref<16x32xf32, #tpu.memory_space<vmem>>, vector<16x16xf32>
    tpu.vector_store %arg6[%c0_10, %c16], %5 {strides = array<i32>} : memref<16x32xf32, #tpu.memory_space<vmem>>, vector<16x16xf32>,
    %c0_11 = arith.constant 0 : index
    %c0_12 = arith.constant 0 : index
    %7 = vector.load %arg6[%c0_11, %c0_12] : memref<16x32xf32, #tpu.memory_space<vmem>>, vector<16x32xf32>
    %cst = arith.constant dense<0.000000e+00> : vector<16x32xf32>
    %8 = tpu.matmul %7, %0, %cst {dimension_numbers = #tpu.dot_dimension_numbers<[1], [0], [0], [1], [0, 0, 1, 1], [], []>, precision = #tpu.contract_precision<fp32>} : vector<16x32xf32>, vector<32x32xf32>, vector<16x32xf32> -> vector<16x32xf32>
    %c0_13 = arith.constant 0 : index
    %c0_14 = arith.constant 0 : index
    %c0_15 = arith.constant 0 : index
    %c0_16 = arith.constant 0 : index
    %9 = vector.load %arg5[%c0_13, %c0_14, %c0_15, %c0_16] : memref<1x1x16x64xf32, #tpu.memory_space<vmem>>, vector<1x1x16x32xf32>
    %10 = vector.shape_cast %9 : vector<1x1x16x32xf32> to vector<16x32xf32>
    %11 = vector.shape_cast %8 : vector<16x32xf32> to vector<1x1x16x32xf32>
    tpu.vector_store %arg5[%c0_13, %c0_14, %c0_15, %c0_16], %11 {strides = array<i32>} : memref<1x1x16x64xf32, #tpu.memory_space<vmem>>, vector<1x1x16x32xf32>,
    %c2 = arith.constant 2 : index
    %c0_17 = arith.constant 0 : index
    %c0_18 = arith.constant 0 : index
    %c0_19 = arith.constant 0 : index
    %12 = vector.load %arg3[%c2, %c0_17, %c0_18, %c0_19] : memref<4x1x16x16xf32, #tpu.memory_space<vmem>>, vector<1x1x16x16xf32>
    %13 = vector.shape_cast %12 : vector<1x1x16x16xf32> to vector<16x16xf32>
    %c0_20 = arith.constant 0 : index
    %c0_21 = arith.constant 0 : index
    %14 = vector.load %arg6[%c0_20, %c0_21] : memref<16x32xf32, #tpu.memory_space<vmem>>, vector<16x16xf32>
    tpu.vector_store %arg6[%c0_20, %c0_21], %13 {strides = array<i32>} : memref<16x32xf32, #tpu.memory_space<vmem>>, vector<16x16xf32>,
    %c3 = arith.constant 3 : index
    %c0_22 = arith.constant 0 : index
    %c0_23 = arith.constant 0 : index
    %c0_24 = arith.constant 0 : index
    %15 = vector.load %arg3[%c3, %c0_22, %c0_23, %c0_24] : memref<4x1x16x16xf32, #tpu.memory_space<vmem>>, vector<1x1x16x16xf32>
    %16 = vector.shape_cast %15 : vector<1x1x16x16xf32> to vector<16x16xf32>
    %c0_25 = arith.constant 0 : index
    %c16_26 = arith.constant 16 : index
    %17 = vector.load %arg6[%c0_25, %c16_26] : memref<16x32xf32, #tpu.memory_space<vmem>>, vector<16x16xf32>
    tpu.vector_store %arg6[%c0_25, %c16_26], %16 {strides = array<i32>} : memref<16x32xf32, #tpu.memory_space<vmem>>, vector<16x16xf32>,
    %c0_27 = arith.constant 0 : index
    %c0_28 = arith.constant 0 : index
    %18 = vector.load %arg6[%c0_27, %c0_28] : memref<16x32xf32, #tpu.memory_space<vmem>>, vector<16x32xf32>
    %cst_29 = arith.constant dense<0.000000e+00> : vector<16x32xf32>
    %19 = tpu.matmul %18, %0, %cst_29 {dimension_numbers = #tpu.dot_dimension_numbers<[1], [0], [0], [1], [0, 0, 1, 1], [], []>, precision = #tpu.contract_precision<fp32>} : vector<16x32xf32>, vector<32x32xf32>, vector<16x32xf32> -> vector<16x32xf32>
    %c0_30 = arith.constant 0 : index
    %c0_31 = arith.constant 0 : index
    %c0_32 = arith.constant 0 : index
    %c32 = arith.constant 32 : index
    %20 = vector.load %arg5[%c0_30, %c0_31, %c0_32, %c32] : memref<1x1x16x64xf32, #tpu.memory_space<vmem>>, vector<1x1x16x32xf32>
    %21 = vector.shape_cast %20 : vector<1x1x16x32xf32> to vector<16x32xf32>
    %22 = vector.shape_cast %19 : vector<16x32xf32> to vector<1x1x16x32xf32>
    tpu.vector_store %arg5[%c0_30, %c0_31, %c0_32, %c32], %22 {strides = array<i32>} : memref<1x1x16x64xf32, #tpu.memory_space<vmem>>, vector<1x1x16x32xf32>,
    return
  }
  func.func @transform_0(%arg0: i32, %arg1: i32, %arg2: i32) -> (i32, i32, i32, i32) {
    %c0_i32 = arith.constant 0 : i32
    %c0_i32_0 = arith.constant 0 : i32
    return %arg0, %arg1, %arg2, %c0_i32 : i32, i32, i32, i32
  }
  func.func @transform_1(%arg0: i32, %arg1: i32, %arg2: i32) -> (i32, i32) {
    %c0_i32 = arith.constant 0 : i32
    %c0_i32_0 = arith.constant 0 : i32
    %c0_i32_1 = arith.constant 0 : i32
    return %c0_i32, %c0_i32_0 : i32, i32
  }
  func.func @transform_2(%arg0: i32, %arg1: i32, %arg2: i32) -> (i32, i32, i32, i32) {
    %c0_i32 = arith.constant 0 : i32
    %c0_i32_0 = arith.constant 0 : i32
    return %arg0, %arg1, %arg2, %c0_i32 : i32, i32, i32, i32
  }
}

</mosaic_0001>

<bundles_post_ra>
// kernel: tpu_custom_call.1
= control target key start
LH: loop header
LB: loop body
LE: loop exit
PB: predicated region body
PF: predicated region fallthrough
CT: control target
= control target key end

     0   :  { %7 = vsyncpa [#allocation4], 0  ;;  %s1386_s0 = inlined_call_operand.hbm [shape: f32[8,1,16,16], index: 0, kind: input, shape index: {}]   ;;  %s1387_s1 = inlined_call_operand.hbm [shape: f32[32,32], index: 1, kind: input, shape index: {}]   ;;  %s1388_s2 = inlined_call_operand.hbm [shape: f32[2,1,16,64], index: 2, kind: output, shape index: {}]  }
   0x1   :  { %9 = vsyncpa [#allocation4 + $0x1], 0 }
   0x2   :  { %10 = vsyncpa [#allocation7], 0 }
   0x3   :  { %11 = vsyncpa [#allocation5], 0 }
   0x4   :  { %13 = vsyncpa [#allocation5 + $0x1], 0  ;;  %s1119_s9 = smov 0   ;;  %s1121_s10 = smov 0  }
   0x5   :  { %s1123_s11 = smov 0   ;;  %s1125_s12 = smov 0  }
   0x6   :  { %s1127_s13 = smov 0   ;;  %s1129_s14 = smov 0  }
   0x7 LB: > { %s843_s15 = sadd.s32 4294967295, %s1095_s14   ;;  %s844_s16 = sadd.s32 4294967294, %s1095_s14   ;;  %s1095_s14 = sphi %s1129_s14, %s19_s14   ;;  %s1091_s13 = sphi %s1127_s13, %s1400_s13   ;;  %s1087_s12 = sphi %s1125_s12, %s1399_s12   ;;  %s1083_s11 = sphi %s1123_s11, %s1398_s11   ;;  %s1079_s10 = sphi %s1121_s10, %s1397_s10   ;;  %s1075_s9 = sphi %s1119_s9, %s1396_s9  }
   0x8   : > { %p62_p0 = scmp.ne.s32.totalorder %s1079_s10, %s1075_s9  ;;  %p1153_p1 = scmp.eq.s32.totalorder %s843_s15, 0 }
   0x9   : > { %p1157_p2 = scmp.eq.s32.totalorder %s843_s15, 1  ;;  %p117_p3 = scmp.eq.s32.totalorder %s844_s16, 1 }
   0xa   : > { %p1163_p4 = por %p1153_p1, %p62_p0  ;;  %p845_p5 = scmp.ge.s32.totalorder %s1095_s14, 1 }
   0xb   : > { %p1168_p6 = por %p117_p3, %p62_p0  ;;  %p124_p7 = scmp.lt.s32.totalorder %s1095_s14, 3 }
   0xc   : > { %s135_s23 = sshll.u32 %s1387_s1, 4  ;;  %s1097_s25 = smov [#allocation6]   ;;  %s136_s23 = int_to_ptr.hbm [resolvable:$true] %s135_s23 }
   0xd   : > { %p1176_p8 = pnand %p845_p5, %p124_p7  ;;  %s137_s26 = sshll.u32 %s1097_s25, 4  ;;  %s138_s26 = int_to_ptr.vmem [resolvable:$true] %s137_s26 }
   0xe   : > { %p847_p11 = scmp.ge.s32.totalorder %s1095_s14, 2  ;;  %s1098_s27 = smov 128  }
   0xf   : > { %p878_p9 = pneg %p1176_p8  ;;  %s1099_s28 = smov 8  }
  0x10   : > { %s38_s29 = sadd.s32 1, %s1091_s13  ;;  %s49_s30 = sadd.s32 1, %s1083_s11 }
  0x11   : > { %p879_p10 = pnand %p878_p9, %p1153_p1  ;;  %p40_p12 = scmp.ge.s32.totalorder %s38_s29, 2 }
  0x12   : > { %p56_p13 = scmp.ne.s32.totalorder %s1083_s11, %s1079_s10  ;;  %p57_p0 = scmp.eq.s32.totalorder %s1095_s14, 0 }
  0x13   : > { %881 = dma.hbm_to_vmem [thread:$0]  (!%p879_p10), %s136_s23, 512, %s138_s26, [#allocation7], %s1098_s27, %s1098_s27, %s1099_s28  }
  0x14   : > { %s1402_s29 = smov (%p40_p12, %s38_s29), 0  ;;  %p1195_p3 = por %p57_p0, %p56_p13 }
  0x15   : > { %p1201_p5 = por %p1157_p2, %p56_p13  ;;  %s42_s5 = ssub.s32 %s1091_s13, %s1402_s29 }
  0x16   : > { %p891_p7 = scmp.lt.s32.totalorder %s1095_s14, 2  ;;  %p47_p9 = scmp.eq.s32.totalorder %s42_s5, 0 }
  0x17   : > { %s151_s6 = sand.u32 1, %s1083_s11   ;;  %s868_s15 = sshll.u32 %s1091_s13, 6 }
  0x18   : > { %s848_s7 = sshll.u32 %s151_s6, 6  ;;  %s165_s22 = scalar_lea.hbm %s1386_s0, %s868_s15 }
  0x19   : > { %s1210_s8 = scalar_select %p47_p9, %s1083_s11, %s49_s30  }
  0x1a   : > { %s155_s23 = scalar_lea.vmem [#allocation3], %s848_s7  ;;  %s166_s18 = sshll.u32 %s165_s22, 4  ;;  %s167_s18 = int_to_ptr.hbm [resolvable:$true] %s166_s18 }
  0x1b   : > { %s168_s25 = sshll.u32 %s155_s23, 4  ;;  %p883_p2 = pnand %p891_p7, %p1195_p3  ;;  %s169_s25 = int_to_ptr.vmem [resolvable:$true] %s168_s25 }
  0x1c   : > { %s152_s26 = scalar_lea.sflag [#allocation4], %s151_s6  ;;  %180 = sbr.rel (%p1176_p8) target bundleno = 440 (0x1b8), region = 28 }
  0x1d   : > { %885 = dma.hbm_to_vmem [thread:$0]  (!%p883_p2), %s167_s18, 1024, %s169_s25, %s152_s26, %s1098_s27, %s1098_s27, %s1099_s28  }
  0x1e   : > { %s1224_s30 = sand.u32 (!%p1176_p8), 1, %s1079_s10  }
  0x1f   : > { %s853_s5 = sshll.u32 (!%p1176_p8), %s1224_s30, 6  ;;  %s183_s7 = scalar_lea.sflag (!%p1176_p8), [#allocation4], %s1224_s30 }
  0x20   : > { %s1228_s15 = scalar_lea.vmem (!%p1176_p8), [#allocation3], %s853_s5 }
  0x21   : > { %1062 = dma.done.wait (%p1163_p4), %s183_s7, 1024  }
  0x22   : > { %1064 = vsyncadd (%p1163_p4), %s183_s7, 4294966272 }
  0x23   : > { %1066 = dma.done.wait (%p1153_p1), [#allocation7], 512  }
  0x24   : > { %1068 = vsyncadd (%p1153_p1), [#allocation7], 4294966784  ;;  %v856_v0 = vld [vmem:[%s1228_s15 + $0x10] sm:$0xff]  ;;  %s1100_s24 = smov 16   ;;  %v857_v2 = vld [vmem:[%s1228_s15 + $0x18] sm:$0xff]  ;;  %vm222_vm0 = vcmask 130048  }
  0x25   : > { %v860_v1 = vld [vmem:[%s1228_s15 + $0x30] sm:$0xff]  ;;  %230 = vrot.lane.b32.xlu0 %v856_v0, %s1100_s24  ;;  %v861_v3 = vld [vmem:[%s1228_s15 + $0x38] sm:$0xff]  ;;  %v217_v9 = vld [vmem:[#allocation6 + $0x8] sm:$0xff]  ;;  %vm236_vm1 = vcmask 261248   ;;  %vm241_vm2 = vcmask 261120   ;;  %s855_s17 = sshll.u32 %s1224_s30, 4 }
  0x26   : > { %476 = vrot.lane.b32.xlu1 %v860_v1, %s1100_s24  ;;  %v219_v4 = vld [vmem:[#allocation6 + $0x18] sm:$0xff]  ;;  %v218_v6 = vld [vmem:[#allocation6 + $0x10] sm:$0xff]  ;;  %v220_v10 = vld [vmem:[%s1228_s15] sm:$0xff]  ;;  %v1259_v13 = vand.u32 4294901760, %v217_v9  ;;  %s1339_s19 = scalar_lea.vmem [#allocation8], %s855_s17  ;;  %s1101_s27 = smov 32  }
  0x27   : > { %v1242_v5 = vand.u32 4294901760, %v219_v4  ;;  %v1247_v8 = vand.u32 4294901760, %v218_v6  ;;  %223 = vst.msk [vmem:[#allocation2] sm:$0xff] %vm222_vm0, %v220_v10  ;;  %v216_v14 = vld [vmem:[#allocation6] sm:$0xff]  ;;  %v221_v26 = vld [vmem:[%s1228_s15 + $0x8] sm:$0xff]  ;;  %s869_s28 = sshll.u32 %s1087_s12, 4 }
  0x28   : > { %v1270_v17 = vsub.f32 %v217_v9, %v1259_v13  ;;  %v1273_v18 = vand.u32 4294901760, %v216_v14  ;;  %224 = vst.msk [vmem:[#allocation2 + $0x8] sm:$0xff] %vm222_vm0, %v221_v26  ;;  %v858_v32 = vld [vmem:[%s1228_s15 + $0x20] sm:$0xff]  ;;  %v859_v39 = vld [vmem:[%s1228_s15 + $0x28] sm:$0xff]  ;;  %vm716_vm3 = vcmask 523520   ;;  %s735_s16 = scalar_lea.hbm %s1388_s2, %s869_s28  ;;  %s736_s21 = sshll.u32 %s1339_s19, 4  ;;  %s737_s21 = int_to_ptr.vmem [resolvable:$true] %s736_s21 }
  0x29   : > { %v1245_v7 = vsub.f32 %v219_v4, %v1242_v5  ;;  %378 = vmatpush.msra.mxu3 %v1242_v5  ;;  %261 = vmatpush.msra.mxu0 %v1242_v5  ;;  %v1256_v12 = vsub.f32 %v218_v6, %v1247_v8  ;;  %s738_s22 = sshll.u32 %s735_s16, 4  ;;  %s720_s23 = scalar_lea.sflag [#allocation5], %s1224_s30  ;;  %s739_s22 = int_to_ptr.hbm [resolvable:$true] %s738_s22 }
  0x2a   : > { %v1280_v21 = vand.u32 4294901760, %v1270_v17  ;;  %v1283_v22 = vsub.f32 %v216_v14, %v1273_v18  ;;  %s1023_s25 = sshra.s32 %s739_s22, 4  ;;  %s1029_s5 = scalar_lea.hbm %s1388_s2, 32  ;;  %s1024_s25 = int_to_ptr.hbm [resolvable:$true] %s1023_s25 }
  0x2b   : > { %v1253_v11 = vand.u32 4294901760, %v1245_v7  ;;  %344 = vmatpush.msra.mxu2 %v1245_v7  ;;  %380 = vmatpush.msra.mxu3 %v1247_v8  ;;  %v1267_v16 = vand.u32 4294901760, %v1256_v12  ;;  %s1025_s18 = scalar_lea.hbm %s1024_s25, 16  ;;  %p1030_p10 = scmp.lt.s32.totalorder %s1024_s25, %s1388_s2 }
  0x2c   : > { %263 = vmatpush.msra.mxu0 %v1247_v8  ;;  %v312_v24 = vsub.f32 %v1270_v17, %v1280_v21  ;;  %v1291_v25 = vand.u32 4294901760, %v1283_v22  ;;  %p1026_p1 = scmp.ne.s32.totalorder %s1024_s25, %s1025_s18  ;;  %p1031_p12 = scmp.lt.s32.totalorder %s1029_s5, %s1025_s18 }
  0x2d   : > { %232 = vrot.lane.b32.xlu0 %v857_v2, %s1100_s24  ;;  %v300_v15 = vsub.f32 %v1245_v7, %v1253_v11  ;;  %347 = vmatpush.msra.mxu2 %v1256_v12  ;;  %v306_v20 = vsub.f32 %v1256_v12, %v1267_v16 }
  0x2e   : > { %478 = vrot.lane.b32.xlu1 %v861_v3, %s1100_s24  ;;  %382 = vmatpush.msra.mxu3 %v1259_v13  ;;  %v313_v27 = vand.u32 4294901760, %v312_v24  ;;  %v318_v28 = vsub.f32 %v1283_v22, %v1291_v25  ;;  %p1027_p4 = pnand %p1026_p1, %p1201_p5  ;;  %p1032_p13 = por %p1031_p12, %p1030_p10 }
  0x2f   : > { %265 = vmatpush.msra.mxu0 %v1259_v13  ;;  %v301_v19 = vand.u32 4294901760, %v300_v15  ;;  %350 = vmatpush.msra.mxu2 %v1270_v17  ;;  %v307_v23 = vand.u32 4294901760, %v306_v20 }
  0x30   : > { %384 = vmatpush.msra.mxu3 %v1273_v18  ;;  %v319_v29 = vand.u32 4294901760, %v318_v28  ;;  %p1028_p8 = pneg %p1027_p4 }
  0x31   : > { %267 = vmatpush.msra.mxu0 %v1273_v18  ;;  %302 = vmatpush.msra.mxu1 %v301_v19 }
  0x32   : > { %353 = vmatpush.msra.mxu2 %v1283_v22  ;;  %546 = vmatpush.msrb.mxu3 %v301_v19  ;;  %p1033_p0 = pnand %p1032_p13, %p1028_p8 }
  0x33   : > { %413 = vmatpush.msrb.mxu0 %v1253_v11  ;;  %308 = vmatpush.msra.mxu1 %v307_v23 }
  0x34   : > { %505 = vmatpush.msrb.mxu2 %v1242_v5  ;;  %552 = vmatpush.msrb.mxu3 %v307_v23 }
  0x35   : > { %417 = vmatpush.msrb.mxu0 %v1267_v16  ;;  %314 = vmatpush.msra.mxu1 %v313_v27 }
  0x36   : > { %507 = vmatpush.msrb.mxu2 %v1247_v8  ;;  %558 = vmatpush.msrb.mxu3 %v313_v27 }
  0x37   : > { %421 = vmatpush.msrb.mxu0 %v1280_v21  ;;  %320 = vmatpush.msra.mxu1 %v319_v29 }
  0x38   : > { %509 = vmatpush.msrb.mxu2 %v1259_v13  ;;  %564 = vmatpush.msrb.mxu3 %v319_v29 }
  0x39   : > { %448 = vmatpush.msrb.mxu1 %v1242_v5  ;;  %425 = vmatpush.msrb.mxu0 %v1291_v25 }
  0x3a   : > { %511 = vmatpush.msrb.mxu2 %v1273_v18 }
  0x3b   : > { %450 = vmatpush.msrb.mxu1 %v1247_v8 }
  0x3d   : > { %452 = vmatpush.msrb.mxu1 %v1259_v13 }
  0x3f   : > { %454 = vmatpush.msrb.mxu1 %v1273_v18 }
  0x97   : > { %v231_v30 = vpop.permute.xlu0 %230 }
  0x98   : > { %237 = vst.msk [vmem:[#allocation2] sm:$0xff] %vm236_vm1, %v231_v30  ;;  %v477_v31 = vpop.permute.xlu1 %476 }
  0x9f   : > { %v233_v33 = vpop.permute.xlu0 %232  ;;  %v239_v34 = vld [vmem:[#allocation2] sm:$0xff] }
  0xa0   : > { %238 = vst.msk [vmem:[#allocation2 + $0x8] sm:$0xff] %vm236_vm1, %v233_v33  ;;  %v243_v35 = vsel %vm241_vm2, %v239_v34, 0  ;;  %v479_v40 = vpop.permute.xlu1 %478 }
  0xa1   : > { %469 = vst.msk [vmem:[#allocation2] sm:$0xff] %vm222_vm0, %v858_v32  ;;  %v268_v36 = vand.u32 4294901760, %v243_v35 }
  0xa2   : > { %482 = vst.msk [vmem:[#allocation2] sm:$0xff] %vm236_vm1, %v477_v31 }
  0xa3   : > { %322 = vmatmul.f32.vlgmr.msra.gmra.mxu1 %v268_v36  ;;  %v269_v37 = vsub.f32 %v243_v35, %v268_v36 }
  0xa4   : > { %622 = vmatpush.msra.mxu1 %v1242_v5 }
  0xa5   : > { %356 = vmatmul.f32.vlgmr.msra.gmra.mxu2 %v269_v37  ;;  %v270_v38 = vand.u32 4294901760, %v269_v37 }
  0xa6   : > { %657 = vmatpush.msra.mxu2 %v1253_v11  ;;  %624 = vmatpush.msra.mxu1 %v1247_v8 }
  0xa7   : > { %388 = vmatmul.f32.vlgmr.msra.gmra.mxu3 %v270_v38  ;;  %v240_v41 = vld [vmem:[#allocation2 + $0x8] sm:$0xff]  ;;  %v271_v42 = vsub.f32 %v269_v37, %v270_v38 }
  0xa8   : > { %470 = vst.msk [vmem:[#allocation2 + $0x8] sm:$0xff] %vm222_vm0, %v859_v39  ;;  %v246_v43 = vsel %vm241_vm2, %v240_v41, 0  ;;  %692 = vmatpush.msra.mxu3 %v1242_v5  ;;  %661 = vmatpush.msra.mxu2 %v1267_v16 }
  0xa9   : > { %483 = vst.msk [vmem:[#allocation2 + $0x8] sm:$0xff] %vm236_vm1, %v479_v40  ;;  %v272_v44 = vand.u32 4294901760, %v271_v42  ;;  %v276_v45 = vand.u32 4294901760, %v246_v43  ;;  %v484_v46 = vld [vmem:[#allocation2] sm:$0xff]  ;;  %626 = vmatpush.msra.mxu1 %v1259_v13 }
  0xaa   : > { %v487_v47 = vsel %vm241_vm2, %v484_v46, 0  ;;  %694 = vmatpush.msra.mxu3 %v1247_v8  ;;  %665 = vmatpush.msra.mxu2 %v1280_v21 }
  0xab   : > { %273 = vmatmul.f32.vlgmr.msra.gmra.mxu0 %v272_v44  ;;  %326 = vmatmul.f32.gmra.mxu1 %v276_v45  ;;  %v277_v48 = vsub.f32 %v246_v43, %v276_v45  ;;  %v512_v49 = vand.u32 4294901760, %v487_v47 }
  0xac   : > { %588 = vmatpush.msra.mxu0 %v1245_v7  ;;  %628 = vmatpush.msra.mxu1 %v1273_v18 }
  0xad   : > { %361 = vmatmul.f32.gmra.mxu2 %v277_v48  ;;  %v278_v50 = vand.u32 4294901760, %v277_v48  ;;  %v513_v51 = vsub.f32 %v487_v47, %v512_v49  ;;  %696 = vmatpush.msra.mxu3 %v1259_v13 }
  0xae   : > { %591 = vmatpush.msra.mxu0 %v1256_v12  ;;  %669 = vmatpush.msra.mxu2 %v1291_v25 }
  0xaf   : > { %394 = vmatmul.f32.gmra.mxu3 %v278_v50  ;;  %v279_v52 = vsub.f32 %v277_v48, %v278_v50  ;;  %v514_v53 = vand.u32 4294901760, %v513_v51 }
  0xb0   : > { %v485_v54 = vld [vmem:[#allocation2 + $0x8] sm:$0xff]  ;;  %594 = vmatpush.msra.mxu0 %v1270_v17  ;;  %698 = vmatpush.msra.mxu3 %v1273_v18 }
  0xb1   : > { %v280_v55 = vand.u32 4294901760, %v279_v52  ;;  %v515_v56 = vsub.f32 %v513_v51, %v514_v53  ;;  %v490_v57 = vsel %vm241_vm2, %v485_v54, 0 }
  0xb2   : > { %v520_v58 = vand.u32 4294901760, %v490_v57  ;;  %597 = vmatpush.msra.mxu0 %v1283_v22 }
  0xb3   : > { %281 = vmatmul.f32.gmra.mxu0 %v280_v55  ;;  %456 = vmatmul.f32.vlgmr.msrb.gmra.mxu1 %v268_v36  ;;  %v516_v59 = vand.u32 4294901760, %v515_v56 }
  0xb4   : > { %v521_v60 = vsub.f32 %v490_v57, %v520_v58 }
  0xb5   : > { %517 = vmatmul.f32.vlgmr.msrb.gmra.mxu2 %v516_v59 }
  0xb6   : > { %v522_v61 = vand.u32 4294901760, %v521_v60 }
  0xb7   : > { %566 = vmatmul.f32.vlgmr.msrb.gmra.mxu3 %v512_v49 }
  0xb8   : > { %v523_v62 = vsub.f32 %v521_v60, %v522_v61 }
  0xba   : > { %v524_v63 = vand.u32 4294901760, %v523_v62 }
  0xbb   : > { %427 = vmatmul.f32.vlgmr.msrb.gmra.mxu0 %v268_v36  ;;  %460 = vmatmul.f32.gmra.mxu1 %v276_v45 }
  0xbd   : > { %525 = vmatmul.f32.gmra.mxu2 %v524_v63 }
  0xbf   : > { %570 = vmatmul.f32.gmra.mxu3 %v520_v58 }
  0xc3   : > { %431 = vmatmul.f32.gmra.mxu0 %v276_v45  ;;  %632 = vmatmul.f32.vlgmr.msra.gmra.mxu1 %v514_v53 }
  0xc5   : > { %671 = vmatmul.f32.vlgmr.msra.gmra.mxu2 %v512_v49 }
  0xc7   : > { %700 = vmatmul.f32.vlgmr.msra.gmra.mxu3 %v512_v49 }
  0xcb   : > { %600 = vmatmul.f32.vlgmr.msra.gmra.mxu0 %v513_v51  ;;  %638 = vmatmul.f32.gmra.mxu1 %v522_v61 }
  0xcd   : > { %675 = vmatmul.f32.gmra.mxu2 %v520_v58 }
  0xcf   : > { %704 = vmatmul.f32.gmra.mxu3 %v520_v58 }
  0xd3   : > { %605 = vmatmul.f32.gmra.mxu0 %v521_v60 }
 0x120   : > { %v323_v0 = vpop.f32.mrf.mxu1 }
 0x128   : > { %v274_v1 = vpop.f32.mrf.mxu0  ;;  %v357_v2 = vpop.f32.mrf.mxu2 }
 0x129   : > { %v327_v3 = vpop.f32.mrf.mxu1  ;;  %v324_v5 = vadd.f32 %v323_v0, %v274_v1 }
 0x12a   : > { %v389_v4 = vpop.f32.mrf.mxu3 }
 0x12b   : > { %v358_v9 = vadd.f32 %v357_v2, %v324_v5 }
 0x12d   : > { %v390_v11 = vadd.f32 %v389_v4, %v358_v9 }
 0x130   : > { %v282_v6 = vpop.f32.mrf.mxu0  ;;  %v362_v7 = vpop.f32.mrf.mxu2 }
 0x131   : > { %v457_v10 = vpop.f32.mrf.mxu1  ;;  %v328_v12 = vadd.f32 %v327_v3, %v282_v6 }
 0x132   : > { %v395_v8 = vpop.f32.mrf.mxu3 }
 0x133   : > { %v363_v17 = vadd.f32 %v362_v7, %v328_v12 }
 0x135   : > { %v396_v20 = vadd.f32 %v395_v8, %v363_v17 }
 0x138   : > { %v428_v13 = vpop.f32.mrf.mxu0  ;;  %v518_v15 = vpop.f32.mrf.mxu2 }
 0x139   : > { %v429_v14 = vadd.f32 %v428_v13, %v390_v11  ;;  %v461_v19 = vpop.f32.mrf.mxu1 }
 0x13a   : > { %v567_v16 = vpop.f32.mrf.mxu3 }
 0x13b   : > { %v458_v18 = vadd.f32 %v457_v10, %v429_v14  ;;  %v568_v26 = vadd.f32 %v567_v16, %v518_v15 }
 0x13d   : > { %464 = vst.msk [vmem:[%s1339_s19] sm:$0xff] %vm241_vm2, %v458_v18 }
 0x140   : > { %v432_v21 = vpop.f32.mrf.mxu0  ;;  %v526_v23 = vpop.f32.mrf.mxu2 }
 0x141   : > { %v433_v22 = vadd.f32 %v432_v21, %v396_v20  ;;  %v633_v27 = vpop.f32.mrf.mxu1 }
 0x142   : > { %v571_v24 = vpop.f32.mrf.mxu3 }
 0x143   : > { %v462_v25 = vadd.f32 %v461_v19, %v433_v22  ;;  %v572_v34 = vadd.f32 %v571_v24, %v526_v23 }
 0x145   : > { %465 = vst.msk [vmem:[%s1339_s19 + $0x8] sm:$0xff] %vm241_vm2, %v462_v25 }
 0x148   : > { %v601_v28 = vpop.f32.mrf.mxu0  ;;  %v672_v30 = vpop.f32.mrf.mxu2 }
 0x149   : > { %v602_v29 = vadd.f32 %v601_v28, %v568_v26  ;;  %v639_v38 = vpop.f32.mrf.mxu1 }
 0x14a   : > { %v701_v32 = vpop.f32.mrf.mxu3 }
 0x14b   : > { %v634_v31 = vadd.f32 %v633_v27, %v602_v29 }
 0x14d   : > { %v673_v33 = vadd.f32 %v672_v30, %v634_v31 }
 0x14f   : > { %v702_v35 = vadd.f32 %v701_v32, %v673_v33 }
 0x150   : > { %v606_v36 = vpop.f32.mrf.mxu0  ;;  %v676_v40 = vpop.f32.mrf.mxu2 }
 0x151   : > { %v607_v37 = vadd.f32 %v606_v36, %v572_v34  ;;  %710 = vrot.lane.b32.xlu2 %v702_v35, %s1101_s27 }
 0x152   : > { %v705_v42 = vpop.f32.mrf.mxu3 }
 0x153   : > { %v640_v39 = vadd.f32 %v639_v38, %v607_v37 }
 0x155   : > { %v677_v41 = vadd.f32 %v676_v40, %v640_v39 }
 0x157   : > { %v706_v43 = vadd.f32 %v705_v42, %v677_v41 }
 0x159   : > { %712 = vrot.lane.b32.xlu2 %v706_v43, %s1101_s27 }
 0x1ab   : > { %v711_v44 = vpop.permute.xlu2 %710 }
 0x1ac   : > { %717 = vst.msk [vmem:[%s1339_s19] sm:$0xff] %vm716_vm3, %v711_v44 }
 0x1b3   : > { %v713_v45 = vpop.permute.xlu2 %712 }
 0x1b4   : > { %718 = vst.msk [vmem:[%s1339_s19 + $0x8] sm:$0xff] %vm716_vm3, %v713_v45 }
 0x1b5   : > { %1036 = shalt.err (!%p1033_p0)
}
 0x1b6   : > { %s1102_s30 = smov 128   ;;  %s1103_s24 = smov 8  }
 0x1b7   : > { %876 = dma.vmem_to_hbm [thread:$0]  (%p1201_p5), %s737_s21, 256, %s739_s22, %s720_s23, %s1102_s30, %s1102_s30, %s1103_s24  }
 0x1b8 PF: > { %s753_s17 = sand.u32 1, %s1075_s9   ;;  %p887_p3 = pnand %p847_p11, %p1168_p6 }
 0x1b9   : > { %s754_s19 = scalar_lea.sflag [#allocation5], %s753_s17 }
 0x1ba   : > { %p888_p7 = pneg %p887_p3 }
 0x1bc   : > { %1070 = dma.done.wait (%p888_p7), %s754_s19, 256  }
 0x1bd   : > { %1072 = vsyncadd (%p888_p7), %s754_s19, 4294967040  ;;  %s19_s14 = sadd.s32 1, %s1095_s14   ;;  %s1396_s9 = smov %s1079_s10 }
 0x1be   : > { %p16_p9 = scmp.ge.s32.totalorder %s19_s14, 4   ;;  %s1397_s10 = smov %s1083_s11 }
 0x1bf   : > { %s1398_s11 = smov %s1210_s8  ;;  %s1399_s12 = smov %s1091_s13 }
 0x1c0   : > { %s1400_s13 = smov %s1402_s29  ;;  %18 = sbr.rel (!%p16_p9) target bundleno = 7 (0x7), region = 80 }
 0x1c5   :  { %760 = vsyncpa [#allocation4], 1 }
 0x1c6   :  { %762 = vsyncpa [#allocation4 + $0x1], 1 }
 0x1c7   :  { %763 = vsyncpa [#allocation7], 1 }
 0x1c8   :  { %764 = vsyncpa [#allocation5], 1 }
 0x1c9   :  { %766 = vsyncpa [#allocation5 + $0x1], 1 }

</bundles_post_ra>
